<compile_context>
chip_gen: v5e
topology: v5e:2x2
jax: 0.10.0
libtpu: 0.0.40
codegen_flags: <defaults>
</compile_context>

<pallas_src>
import jax
import jax.numpy as jnp
from jax.experimental import pallas as pl
from jax.experimental.pallas import tpu as pltpu

# ----------------------------- configuration --------------------------------
B, C1, C2 = 2, 4, 32
H, W = 16, 16


# ------------------------------ wrapper + kernel ------------------------------
def classify(x_nchw, params):
    """Pallas implementation of Classify.forward for a single input tensor.

    x_nchw: (B, C1, H, W) float32.  Returns (B, C2) == flatten(conv1x1(aap(x))).
    """
    # TODO(synk): list-of-feature-maps input (multi-scale channel concat) and the
    #             general k>1 / strided / grouped conv paths are not modeled; only the
    #             default Classify(c1, c2) configuration (k=1, s=1, p=0, g=1).
    b, c1, h, w = x_nchw.shape
    s = h * w
    inv_s = 1.0 / float(s)

    x_tok = x_nchw.reshape(b, c1, s)          # contiguous reshape, no copy: spatial -> lanes
    w_mat = params["conv_w"]                  # (C1, C2), unmodified (no per-call prescale op)
    bias = params["conv_b"].reshape(1, -1)    # (1, C2), metadata-only reshape
    c2 = w_mat.shape[1]

    def kernel(x_ref, w_ref, b_ref, o_ref):
        # AdaptiveAvgPool2d(1): full-width lane reduction; the 1/S scale rides an idle
        # VALU slot in-kernel instead of costing a separate XLA dispatch in the wrapper.
        pooled = jnp.sum(x_ref[...], axis=-1) * inv_s                       # (B, C1), exact f32
        # 1x1 conv on a (1,1) spatial map == linear layer: small MXU matmul, f32 acc.
        y = jnp.dot(pooled, w_ref[...], preferred_element_type=jnp.float32)  # (B, C2)
        o_ref[...] = y + b_ref[...]                                          # flatten implicit

    cost = pl.CostEstimate(
        flops=b * c1 * s + b * c1 + 2 * b * c1 * c2 + b * c2,
        transcendentals=0,
        bytes_accessed=(x_tok.size + w_mat.size + bias.size + b * c2) * 4,
    )

    # NOTE (scaling only): at (B, C2) = (2, 32) the output store is a masked vst and a
    # single-TC call; if B/C2 ever grow, present a lane-dense output (pad C2 to 128 or
    # flatten to (1, B*C2)) and add a grid over B with dimension_semantics=("parallel",)
    # so both v7x TensorCores get work.  Not worth it at this size (per-step ~0.35 us).
    return pl.pallas_call(
        kernel,
        out_shape=jax.ShapeDtypeStruct((b, c2), jnp.float32),
        in_specs=[pl.BlockSpec(memory_space=pltpu.MemorySpace.VMEM)] * 3,
        out_specs=pl.BlockSpec(memory_space=pltpu.MemorySpace.VMEM),
        cost_estimate=cost,
    )(x_tok, w_mat, bias)


# --------------------------- pure-JAX reference -------------------------------
def reference(x_nchw, params):
    z = jnp.mean(x_nchw, axis=(2, 3))                      # AdaptiveAvgPool2d(1) + flatten
    return z @ params["conv_w"] + params["conv_b"]         # 1x1 conv (with bias)


# ------------------------------ parameters ------------------------------------
def init_params(key):
    k1, k2 = jax.random.split(key)
    return {
        # (C1, C2) == PyTorch conv weight (C2, C1, 1, 1) squeezed + transposed for x @ W.
        "conv_w": jax.random.normal(k1, (C1, C2), jnp.float32) / (C1 ** 0.5),
        "conv_b": 0.1 * jax.random.normal(k2, (C2,), jnp.float32),
    }


# --------------------------------- main ---------------------------------------
if __name__ == "__main__":
    key = jax.random.PRNGKey(0)
    kx, kp = jax.random.split(key)
    x = jax.random.normal(kx, (B, C1, H, W), dtype=jnp.float32)
    params = init_params(kp)

    out = jax.block_until_ready(classify(x, params))
    assert out.shape == (B, C2), out.shape

    ref = reference(x, params)
    err = float(jnp.max(jnp.abs(out - ref)))
    if not jnp.allclose(out, ref, rtol=1e-4, atol=1e-4):
        raise AssertionError(f"Pallas output mismatch vs reference (max abs err {err:e})")

    print("KERNEL_OK")
</pallas_src>

<mosaic_0001>
module attributes {stable_mosaic.version = 11 : i64} {
  func.func @kernel(%arg0: memref<2x4x256xf32, #tpu.memory_space<vmem>>, %arg1: memref<4x32xf32, #tpu.memory_space<vmem>>, %arg2: memref<1x32xf32, #tpu.memory_space<vmem>>, %arg3: memref<2x32xf32, #tpu.memory_space<vmem>>) attributes {dimension_semantics = [], scalar_prefetch = 0 : i64, scratch_operands = 0 : i64, tpu.core_type = #tpu.core_type<tc>} {
    %c0 = arith.constant 0 : index
    %c0_0 = arith.constant 0 : index
    %c0_1 = arith.constant 0 : index
    %0 = vector.load %arg0[%c0, %c0_0, %c0_1] : memref<2x4x256xf32, #tpu.memory_space<vmem>>, vector<2x4x256xf32>
    %cst = arith.constant dense<0.000000e+00> : vector<2x4xf32>
    %1 = vector.multi_reduction <add>, %0, %cst [2] : vector<2x4x256xf32> to vector<2x4xf32>
    %cst_2 = arith.constant 3.906250e-03 : f32
    %2 = vector.broadcast %cst_2 : f32 to vector<2x4xf32>
    %3 = arith.mulf %1, %2 : vector<2x4xf32>
    %c0_3 = arith.constant 0 : index
    %c0_4 = arith.constant 0 : index
    %4 = vector.load %arg1[%c0_3, %c0_4] : memref<4x32xf32, #tpu.memory_space<vmem>>, vector<4x32xf32>
    %cst_5 = arith.constant dense<0.000000e+00> : vector<2x32xf32>
    %5 = tpu.matmul %3, %4, %cst_5 {dimension_numbers = #tpu.dot_dimension_numbers<[1], [0], [0], [1], [0, 0, 1, 1], [], []>} : vector<2x4xf32>, vector<4x32xf32>, vector<2x32xf32> -> vector<2x32xf32>
    %c0_6 = arith.constant 0 : index
    %c0_7 = arith.constant 0 : index
    %6 = vector.load %arg2[%c0_6, %c0_7] : memref<1x32xf32, #tpu.memory_space<vmem>>, vector<1x32xf32>
    %7 = vector.broadcast %6 : vector<1x32xf32> to vector<2x32xf32>
    %8 = arith.addf %5, %7 : vector<2x32xf32>
    %c0_8 = arith.constant 0 : index
    %c0_9 = arith.constant 0 : index
    %9 = vector.load %arg3[%c0_8, %c0_9] : memref<2x32xf32, #tpu.memory_space<vmem>>, vector<2x32xf32>
    tpu.vector_store %arg3[%c0_8, %c0_9], %8 {strides = array<i32>} : memref<2x32xf32, #tpu.memory_space<vmem>>, vector<2x32xf32>,
    return
  }
}

</mosaic_0001>

<bundles_post_ra>
// kernel: tpu_custom_call.1
= control target key start
LH: loop header
LB: loop body
LE: loop exit
PB: predicated region body
PF: predicated region fallthrough
CT: control target
= control target key end

     0   :  { %8 = vsyncpa [#allocation3], 0  ;;  %s255_s0 = inlined_call_operand.hbm [shape: f32[2,4,256], index: 0, kind: input, shape index: {}]   ;;  %s256_s1 = inlined_call_operand.hbm [shape: f32[4,32], index: 1, kind: input, shape index: {}]   ;;  %s257_s2 = inlined_call_operand.vmem [shape: f32[1,32], index: 2, kind: input, shape index: {}]   ;;  %s258_s3 = inlined_call_operand.hbm [shape: f32[2,32], index: 3, kind: output, shape index: {}]  }
   0x1   :  { %9 = vsyncpa [#allocation6], 0 }
   0x2   :  { %10 = vsyncpa [#allocation4], 0  ;;  %s15_s14 = sshll.u32 %s255_s0, 4  ;;  %s218_s15 = smov [#allocation2]   ;;  %s16_s14 = int_to_ptr.hbm [resolvable:$true] %s15_s14 }
   0x3   :  { %s17_s16 = sshll.u32 %s218_s15, 4  ;;  %s29_s19 = sshll.u32 %s256_s1, 4  ;;  %s18_s16 = int_to_ptr.vmem [resolvable:$true] %s17_s16  ;;  %s30_s19 = int_to_ptr.hbm [resolvable:$true] %s29_s19 }
   0x4   :  { %s219_s20 = smov 128   ;;  %s220_s21 = smov 8  }
   0x5   :  { %23 = dma.hbm_to_vmem [thread:$0]  %s16_s14, 256, %s18_s16, [#allocation3], %s219_s20, %s219_s20, %s220_s21  }
   0x6   :  { %s221_s22 = smov [#allocation5]  }
   0x7   :  { %s31_s23 = sshll.u32 %s221_s22, 4  ;;  %s32_s23 = int_to_ptr.vmem [resolvable:$true] %s31_s23 }
   0x8   :  { %34 = dma.hbm_to_vmem [thread:$0]  %s30_s19, 64, %s32_s23, [#allocation6]  }
   0x9   :  { %212 = dma.done.wait [#allocation3], 256  }
   0xa   :  { %213 = vsyncadd [#allocation3], 4294967040 }
   0xb   :  { %214 = dma.done.wait [#allocation6], 64  }
   0xc   :  { %215 = vsyncadd [#allocation6], 4294967232  ;;  %v45_v0 = vld [vmem:[#allocation2] sm:$0xff]  ;;  %v46_v1 = vld [vmem:[#allocation2 + $0x8] sm:$0xff]  ;;  %vm60_vm0 = vcmask 1043456   ;;  %v80_v14 = vlaneseq  ;;  %vm84_vm1 = vcmask 1041409  }
   0xd   :  { %49 = vst [vmem:[#allocation1] ss:$2 sm:$0xff] %v45_v0  ;;  %v73_v12 = vld [vmem:[#allocation5] sm:$0xf]  ;;  %vm86_vm2 = vcmask 31744   ;;  %s222_s24 = smov [#allocation7]  }
   0xe   :  { %53 = vst [vmem:[#allocation1 + $0x10] ss:$2 sm:$0xff] %v46_v1  ;;  %132 = vmatpush.msk.msra.mxu0 %vm60_vm0, %v73_v12  ;;  %v81_v15 = vand.u32 127, %v80_v14  ;;  %v139_v22 = vld [vmem:[%s257_s2] ss:$0 sm:$0xff]  ;;  %s119_s25 = sshll.u32 %s222_s24, 4  ;;  %s120_s25 = int_to_ptr.vmem [resolvable:$true] %s119_s25 }
   0xf   :  { %s121_s28 = sshll.u32 %s258_s3, 4  ;;  %vm112_vm3 = vcmask 254976   ;;  %s122_s28 = int_to_ptr.hbm [resolvable:$true] %s121_s28 }
  0x14   :  { %v50_v2 = vld.sshfl [vmem:[#allocation1] sm:$0xff pattern:$0x75316420]  ;;  %v51_v3 = vld.sshfl [vmem:[#allocation1 + $0x8] sm:$0xff pattern:$0x75316420] }
  0x15   :  { %v61_v4 = vsel %vm60_vm0, %v50_v2, 0.0  ;;  %v62_v5 = vsel %vm60_vm0, %v51_v3, 0.0  ;;  %v54_v7 = vld.sshfl [vmem:[#allocation1 + $0x10] sm:$0xff pattern:$0x75316420] }
  0x16   :  { %v63_v6 = vadd.f32 %v62_v5, %v61_v4  ;;  %v55_v8 = vld.sshfl [vmem:[#allocation1 + $0x18] sm:$0xff pattern:$0x75316420]  ;;  %v66_v9 = vsel %vm60_vm0, %v54_v7, 0.0 }
  0x17   :  { %v67_v10 = vsel %vm60_vm0, %v55_v8, 0.0 }
  0x18   :  { %64 = vadd.xlane.f32.xlu0 %v63_v6  ;;  %v68_v11 = vadd.f32 %v67_v10, %v66_v9 }
  0x20   :  { %69 = vadd.xlane.f32.xlu0 %v68_v11 }
  0x8b   :  { %v65_v13 = vpop.xlane.xlu0 %64 }
  0x8c   :  { %v71_v16 = vmul.f32 0.00390625, %v65_v13 }
  0x8e   :  { %v82_v19 = vperm.slane %v71_v16, %v81_v15 }
  0x93   :  { %v70_v17 = vpop.xlane.xlu0 %69 }
  0x94   :  { %v72_v18 = vmul.f32 0.00390625, %v70_v17 }
  0x96   :  { %v83_v20 = vperm.slane %v72_v18, %v81_v15 }
  0x98   :  { %v85_v21 = vsel %vm84_vm1, %v83_v20, %v82_v19 }
  0x99   :  { %133 = vmatmul.msk.f32.vlgmr.msra.gmra.mxu0 %vm86_vm2, %v85_v21 }
 0x116   :  { %v109_v23 = vpop.f32.mrf.mxu0 }
 0x117   :  { %v110_v24 = vadd.f32 %v139_v22, %v109_v23 }
 0x119   :  { %113 = vst.msk [vmem:[#allocation7] sm:$0x3] %vm112_vm3, %v110_v24 }
 0x11a   :  { %124 = dma.vmem_to_hbm [thread:$0]  %s120_s25, 32, %s122_s28, [#allocation4]  }
 0x11b   :  { %216 = dma.done.wait [#allocation4], 32  }
 0x11c   :  { %217 = vsyncadd [#allocation4], 4294967264 }
 0x11d   :  { %129 = vsyncpa [#allocation3], 1 }
 0x11e   :  { %130 = vsyncpa [#allocation6], 1 }
 0x11f   :  { %131 = vsyncpa [#allocation4], 1 }

</bundles_post_ra>
